<compile_context>
chip_gen: v6e
topology: v6e:2x2x1
jax: 0.10.0
libtpu: 0.0.40
codegen_flags: <defaults>
</compile_context>

<pallas_src>
import jax
import jax.numpy as jnp
from jax.experimental import pallas as pl
from jax.experimental.pallas import tpu as pltpu


# ----------------------------- Pallas kernel -----------------------------
def _patch_proj_kernel(x_ref, w_ref, b_ref, o_ref):
    """One (batch b, patch-block pb) grid step.

    x_ref: (C, TP, S)   TP patches of batch b; x_ref[c, p, s] = x[b, c, p*S + s]
    w_ref: (C, S, H)    w_ref[c, s, h] == Linear.weight[c*S + s, h] (resident in VMEM)
    b_ref: (1, H)       bias (resident in VMEM)
    o_ref: (TP, H)      projected patches for this block
    """
    C = x_ref.shape[0]
    # Contract over the flattened (c*S + s) axis as C small MXU dots,
    # accumulating in float32 (effective K = C*S).
    acc = jnp.dot(x_ref[0], w_ref[0], preferred_element_type=jnp.float32)
    for c in range(1, C):  # static loop, C is small
        acc = acc + jnp.dot(x_ref[c], w_ref[c], preferred_element_type=jnp.float32)
    o_ref[...] = (acc + b_ref[...].astype(jnp.float32)).astype(o_ref.dtype)


def patch_projection(x, weight3, bias, *, patch_size, tile_patches=None,
                     out_dtype=jnp.float32):
    """Fused sequential1d patching + linear projection.

    x:       (B, C, L) signal
    weight3: (C, S, H) projection weight (nn.Linear weight.T reshaped)
    bias:    (H,)
    returns  (B, P, H) with P = L // S
    """
    B, C, L = x.shape
    S = patch_size
    assert L % S == 0, "Padded length must be evenly divisible by patch size"
    P = L // S
    Cw, Sw, H = weight3.shape
    assert (Cw, Sw) == (C, S), "weight shape does not match (channels, patch_size)"

    # Tile over patches: big tiles (up to 512 rows) keep the MXU fed and the
    # pipeline near HBM roofline; fits comfortably in VMEM on v5e/v6e/v7x.
    if tile_patches is None:
        TP = P if P <= 512 else 512
    else:
        TP = tile_patches
    # (8, 128) rule: second-to-last block dim must be a multiple of 8 or the full dim.
    assert TP == P or TP % 8 == 0, "tile_patches must be a multiple of 8 or equal P"

    x4 = x.reshape(B, C, P, S)          # free view: splits L -> (P, S), no data movement
    b2 = bias.reshape(1, H)

    grid = (B, pl.cdiv(P, TP))

    return pl.pallas_call(
        _patch_proj_kernel,
        out_shape=jax.ShapeDtypeStruct((B, P, H), out_dtype),
        grid=grid,
        in_specs=[
            # Activations: one batch element, TP patches, all channels per step.
            pl.BlockSpec((None, C, TP, S), lambda b, pb: (b, 0, pb, 0)),
            # Weight / bias: constant index maps -> stay resident in VMEM.
            pl.BlockSpec((C, S, H), lambda b, pb: (0, 0, 0)),
            pl.BlockSpec((1, H), lambda b, pb: (0, 0)),
        ],
        out_specs=pl.BlockSpec((None, TP, H), lambda b, pb: (b, pb, 0)),
        compiler_params=pltpu.CompilerParams(
            dimension_semantics=("parallel", "parallel"),   # v7x: shard across both TCs
            vmem_limit_bytes=32 * 1024 * 1024,              # explicit, safe on v5e/v6e/v7x
        ),
    )(x4, weight3, b2)


# ----------------------------- Module port --------------------------------
class PatchingClassPallas:
    def __init__(self, patch_size=8, hidden_dim=32, padded_length=32,
                 patch_class="sequential1d", channels=4,
                 param_dtype=jnp.float32, key=None):
        assert padded_length % patch_size == 0, \
            "Padded length must be evenly divisible by patch size"
        assert patch_class == "sequential1d", "only sequential1d implemented"
        # TODO(synk): random1d / cyclical1d permutation variants (host-side torch.randperm
        #             / python loops in the reference) are not translated.
        self.patch_size = patch_size
        self.hidden_dim = hidden_dim
        self.padded_length = padded_length
        self.channels = channels
        self.num_patches = padded_length // patch_size

        in_features = patch_size * channels
        if key is None:
            key = jax.random.PRNGKey(0)
        kw, kb = jax.random.split(key)
        # Deterministic init mimicking nn.Linear: U(-1/sqrt(in), 1/sqrt(in)).
        bound = 1.0 / (in_features ** 0.5)
        w2d = jax.random.uniform(kw, (in_features, hidden_dim),
                                 jnp.float32, -bound, bound).astype(param_dtype)
        # Stored once at init as (C, S, H):  weight3[c, s, h] == w2d[c*S + s, h]
        # (matches the flatten(start_dim=2) order c*S + s). No per-call casts/reshapes.
        self.weight3 = w2d.reshape(channels, patch_size, hidden_dim)
        self.bias = jax.random.uniform(kb, (hidden_dim,),
                                       jnp.float32, -bound, bound).astype(param_dtype)

    def __call__(self, x):
        # x: (B, C, L) -> (B, P, H), patching fused into the kernel's BlockSpec.
        return patch_projection(x, self.weight3, self.bias,
                                patch_size=self.patch_size,
                                out_dtype=jnp.float32)


# ----------------------------- Main ---------------------------------------
if __name__ == "__main__":
    key = jax.random.PRNGKey(0)
    k_x, k_params = jax.random.split(key)

    # Small shapes consistent with the module's constraints.
    batch, channels, patch_size, padded_length, hidden_dim = 2, 4, 8, 32, 32
    x = jax.random.normal(k_x, (batch, channels, padded_length), jnp.float32)

    model = PatchingClassPallas(patch_size=patch_size, hidden_dim=hidden_dim,
                                padded_length=padded_length,
                                patch_class="sequential1d",
                                channels=channels, key=k_params)

    out = model(x)
    out = jax.block_until_ready(out)

    # Pure-JAX reference of the same math (explicit unfold/transpose/flatten + Linear).
    P = padded_length // patch_size
    xp = jnp.transpose(x.reshape(batch, channels, P, patch_size), (0, 2, 1, 3))
    xp = xp.reshape(batch, P, channels * patch_size)
    w2d = model.weight3.reshape(channels * patch_size, hidden_dim)
    ref = xp @ w2d + model.bias

    assert out.shape == (batch, P, hidden_dim)
    assert jnp.allclose(out, ref, atol=1e-5), "mismatch vs reference"

    print("KERNEL_OK")
</pallas_src>

<mosaic_0001>
module attributes {stable_mosaic.version = 11 : i64} {
  func.func @_patch_proj_kernel(%arg0: i32, %arg1: i32, %arg2: memref<1x4x4x8xf32, #tpu.memory_space<vmem>>, %arg3: memref<4x8x32xf32, #tpu.memory_space<vmem>>, %arg4: memref<1x32xf32, #tpu.memory_space<vmem>>, %arg5: memref<1x4x32xf32, #tpu.memory_space<vmem>>) attributes {dimension_semantics = [#tpu.dimension_semantics<parallel>, #tpu.dimension_semantics<parallel>], iteration_bounds = array<i64: 2, 1>, scalar_prefetch = 0 : i64, scratch_operands = 0 : i64, tpu.core_type = #tpu.core_type<tc>, window_params = [{transform_indices = @transform_0, window_bounds = array<i64: 1, 4, 4, 8>}, {pipeline_mode = #tpu.pipeline_mode<synchronous>, transform_indices = @transform_1, window_bounds = array<i64: 4, 8, 32>}, {pipeline_mode = #tpu.pipeline_mode<synchronous>, transform_indices = @transform_2, window_bounds = array<i64: 1, 32>}, {transform_indices = @transform_3, window_bounds = array<i64: 1, 4, 32>}]} {
    %c0 = arith.constant 0 : index
    %c0_0 = arith.constant 0 : index
    %c0_1 = arith.constant 0 : index
    %c0_2 = arith.constant 0 : index
    %0 = vector.load %arg2[%c0, %c0_0, %c0_1, %c0_2] : memref<1x4x4x8xf32, #tpu.memory_space<vmem>>, vector<1x1x4x8xf32>
    %1 = vector.shape_cast %0 : vector<1x1x4x8xf32> to vector<4x8xf32>
    %c0_3 = arith.constant 0 : index
    %c0_4 = arith.constant 0 : index
    %c0_5 = arith.constant 0 : index
    %2 = vector.load %arg3[%c0_3, %c0_4, %c0_5] : memref<4x8x32xf32, #tpu.memory_space<vmem>>, vector<1x8x32xf32>
    %3 = vector.shape_cast %2 : vector<1x8x32xf32> to vector<8x32xf32>
    %cst = arith.constant dense<0.000000e+00> : vector<4x32xf32>
    %4 = tpu.matmul %1, %3, %cst {dimension_numbers = #tpu.dot_dimension_numbers<[1], [0], [0], [1], [0, 0, 1, 1], [], []>} : vector<4x8xf32>, vector<8x32xf32>, vector<4x32xf32> -> vector<4x32xf32>
    %c0_6 = arith.constant 0 : index
    %c1 = arith.constant 1 : index
    %c0_7 = arith.constant 0 : index
    %c0_8 = arith.constant 0 : index
    %5 = vector.load %arg2[%c0_6, %c1, %c0_7, %c0_8] : memref<1x4x4x8xf32, #tpu.memory_space<vmem>>, vector<1x1x4x8xf32>
    %6 = vector.shape_cast %5 : vector<1x1x4x8xf32> to vector<4x8xf32>
    %c1_9 = arith.constant 1 : index
    %c0_10 = arith.constant 0 : index
    %c0_11 = arith.constant 0 : index
    %7 = vector.load %arg3[%c1_9, %c0_10, %c0_11] : memref<4x8x32xf32, #tpu.memory_space<vmem>>, vector<1x8x32xf32>
    %8 = vector.shape_cast %7 : vector<1x8x32xf32> to vector<8x32xf32>
    %cst_12 = arith.constant dense<0.000000e+00> : vector<4x32xf32>
    %9 = tpu.matmul %6, %8, %cst_12 {dimension_numbers = #tpu.dot_dimension_numbers<[1], [0], [0], [1], [0, 0, 1, 1], [], []>} : vector<4x8xf32>, vector<8x32xf32>, vector<4x32xf32> -> vector<4x32xf32>
    %10 = arith.addf %4, %9 : vector<4x32xf32>
    %c0_13 = arith.constant 0 : index
    %c2 = arith.constant 2 : index
    %c0_14 = arith.constant 0 : index
    %c0_15 = arith.constant 0 : index
    %11 = vector.load %arg2[%c0_13, %c2, %c0_14, %c0_15] : memref<1x4x4x8xf32, #tpu.memory_space<vmem>>, vector<1x1x4x8xf32>
    %12 = vector.shape_cast %11 : vector<1x1x4x8xf32> to vector<4x8xf32>
    %c2_16 = arith.constant 2 : index
    %c0_17 = arith.constant 0 : index
    %c0_18 = arith.constant 0 : index
    %13 = vector.load %arg3[%c2_16, %c0_17, %c0_18] : memref<4x8x32xf32, #tpu.memory_space<vmem>>, vector<1x8x32xf32>
    %14 = vector.shape_cast %13 : vector<1x8x32xf32> to vector<8x32xf32>
    %cst_19 = arith.constant dense<0.000000e+00> : vector<4x32xf32>
    %15 = tpu.matmul %12, %14, %cst_19 {dimension_numbers = #tpu.dot_dimension_numbers<[1], [0], [0], [1], [0, 0, 1, 1], [], []>} : vector<4x8xf32>, vector<8x32xf32>, vector<4x32xf32> -> vector<4x32xf32>
    %16 = arith.addf %10, %15 : vector<4x32xf32>
    %c0_20 = arith.constant 0 : index
    %c3 = arith.constant 3 : index
    %c0_21 = arith.constant 0 : index
    %c0_22 = arith.constant 0 : index
    %17 = vector.load %arg2[%c0_20, %c3, %c0_21, %c0_22] : memref<1x4x4x8xf32, #tpu.memory_space<vmem>>, vector<1x1x4x8xf32>
    %18 = vector.shape_cast %17 : vector<1x1x4x8xf32> to vector<4x8xf32>
    %c3_23 = arith.constant 3 : index
    %c0_24 = arith.constant 0 : index
    %c0_25 = arith.constant 0 : index
    %19 = vector.load %arg3[%c3_23, %c0_24, %c0_25] : memref<4x8x32xf32, #tpu.memory_space<vmem>>, vector<1x8x32xf32>
    %20 = vector.shape_cast %19 : vector<1x8x32xf32> to vector<8x32xf32>
    %cst_26 = arith.constant dense<0.000000e+00> : vector<4x32xf32>
    %21 = tpu.matmul %18, %20, %cst_26 {dimension_numbers = #tpu.dot_dimension_numbers<[1], [0], [0], [1], [0, 0, 1, 1], [], []>} : vector<4x8xf32>, vector<8x32xf32>, vector<4x32xf32> -> vector<4x32xf32>
    %22 = arith.addf %16, %21 : vector<4x32xf32>
    %c0_27 = arith.constant 0 : index
    %c0_28 = arith.constant 0 : index
    %23 = vector.load %arg4[%c0_27, %c0_28] : memref<1x32xf32, #tpu.memory_space<vmem>>, vector<1x32xf32>
    %24 = vector.broadcast %23 : vector<1x32xf32> to vector<4x32xf32>
    %25 = arith.addf %22, %24 : vector<4x32xf32>
    %c0_29 = arith.constant 0 : index
    %c0_30 = arith.constant 0 : index
    %c0_31 = arith.constant 0 : index
    %26 = vector.load %arg5[%c0_29, %c0_30, %c0_31] : memref<1x4x32xf32, #tpu.memory_space<vmem>>, vector<1x4x32xf32>
    %27 = vector.shape_cast %26 : vector<1x4x32xf32> to vector<4x32xf32>
    %28 = vector.shape_cast %25 : vector<4x32xf32> to vector<1x4x32xf32>
    tpu.vector_store %arg5[%c0_29, %c0_30, %c0_31], %28 {strides = array<i32>} : memref<1x4x32xf32, #tpu.memory_space<vmem>>, vector<1x4x32xf32>,
    return
  }
  func.func @transform_0(%arg0: i32, %arg1: i32) -> (i32, i32, i32, i32) {
    %c0_i32 = arith.constant 0 : i32
    %c0_i32_0 = arith.constant 0 : i32
    %c0_i32_1 = arith.constant 0 : i32
    return %arg0, %c0_i32, %arg1, %c0_i32_0 : i32, i32, i32, i32
  }
  func.func @transform_1(%arg0: i32, %arg1: i32) -> (i32, i32, i32) {
    %c0_i32 = arith.constant 0 : i32
    %c0_i32_0 = arith.constant 0 : i32
    %c0_i32_1 = arith.constant 0 : i32
    %c0_i32_2 = arith.constant 0 : i32
    return %c0_i32, %c0_i32_0, %c0_i32_1 : i32, i32, i32
  }
  func.func @transform_2(%arg0: i32, %arg1: i32) -> (i32, i32) {
    %c0_i32 = arith.constant 0 : i32
    %c0_i32_0 = arith.constant 0 : i32
    %c0_i32_1 = arith.constant 0 : i32
    return %c0_i32, %c0_i32_0 : i32, i32
  }
  func.func @transform_3(%arg0: i32, %arg1: i32) -> (i32, i32, i32) {
    %c0_i32 = arith.constant 0 : i32
    %c0_i32_0 = arith.constant 0 : i32
    return %arg0, %arg1, %c0_i32 : i32, i32, i32
  }
}

</mosaic_0001>

<bundles_post_ra>
// kernel: tpu_custom_call.1
= control target key start
LH: loop header
LB: loop body
LE: loop exit
PB: predicated region body
PF: predicated region fallthrough
CT: control target
= control target key end

     0   :  { %8 = vsyncpa [#allocation3], 0  ;;  %s1126_s0 = inlined_call_operand.hbm [shape: f32[2,4,4,8], index: 0, kind: input, shape index: {}]   ;;  %s1127_s1 = inlined_call_operand.hbm [shape: f32[4,8,32], index: 1, kind: input, shape index: {}]   ;;  %s1128_s2 = inlined_call_operand.vmem [shape: f32[1,32], index: 2, kind: input, shape index: {}]   ;;  %s1129_s3 = inlined_call_operand.hbm [shape: f32[2,4,32], index: 3, kind: output, shape index: {}]  }
   0x1   :  { %10 = vsyncpa [#allocation3 + $0x1], 0 }
   0x2   :  { %11 = vsyncpa [#allocation6], 0 }
   0x3   :  { %12 = vsyncpa [#allocation4], 0 }
   0x4   :  { %14 = vsyncpa [#allocation4 + $0x1], 0  ;;  %s947_s12 = smov 0   ;;  %s949_s13 = smov 0  }
   0x5   :  { %s951_s14 = smov 0   ;;  %s953_s15 = smov 0  }
   0x6   :  { %s955_s16 = smov 0   ;;  %s957_s17 = smov 0  }
   0x7 LB: > { %s646_s18 = sadd.s32 4294967295, %s916_s17   ;;  %s647_s19 = sadd.s32 4294967294, %s916_s17   ;;  %s916_s17 = sphi %s957_s17, %s20_s17   ;;  %s912_s16 = sphi %s955_s16, %s1147_s16   ;;  %s908_s15 = sphi %s953_s15, %s1146_s15   ;;  %s904_s14 = sphi %s951_s14, %s1145_s14   ;;  %s900_s13 = sphi %s949_s13, %s1144_s13   ;;  %s896_s12 = sphi %s947_s12, %s1143_s12  }
   0x8   : > { %p54_p0 = scmp.ne.s32.totalorder %s900_s13, %s896_s12  ;;  %p981_p1 = scmp.eq.s32.totalorder %s646_s18, 0 }
   0x9   : > { %p985_p2 = scmp.eq.s32.totalorder %s646_s18, 1  ;;  %p128_p3 = scmp.eq.s32.totalorder %s647_s19, 1 }
   0xa   : > { %p991_p4 = por %p981_p1, %p54_p0  ;;  %p648_p5 = scmp.ge.s32.totalorder %s916_s17, 1 }
   0xb   : > { %p996_p6 = por %p128_p3, %p54_p0  ;;  %p135_p7 = scmp.lt.s32.totalorder %s916_s17, 3 }
   0xc   : > { %s1133_s22 = scalar_select %p991_p4, 1, 0 }
   0xd   : > { %s1134_s23 = scalar_select %p996_p6, 1, 0 }
   0xe   : > { %p1001_p8 = pnand %p648_p5, %p135_p7  ;;  %s918_s25 = smov [#allocation5]  }
   0xf   : > { %s147_s26 = sshll.u32 %s918_s25, 4  ;;  %s32_s28 = sadd.s32 1, %s912_s16  ;;  %s148_s26 = int_to_ptr.vmem [resolvable:$true] %s147_s26 }
  0x10   : > { %p707_p9 = pneg %p1001_p8  ;;  %s789_s29 = scalar_lea.vmem %s148_s26, 512 }
  0x11   : > { %p790_p13 = scmp.ne.s32.totalorder %s148_s26, %s789_s29  ;;  %p797_p5 = scmp.lt.s32.totalorder %s148_s26, %s148_s26 }
  0x12   : > { %p1010_p11 = pnand %p707_p9, %p981_p1  ;;  %p798_p7 = scmp.lt.s32.totalorder %s789_s29, %s789_s29 }
  0x14   : > { %p780_p12 = pneg %p1010_p11  ;;  %p799_p6 = por %p798_p7, %p797_p5 }
  0x16   : > { %p792_p0 = pnand %p790_p13, %p780_p12 }
  0x18   : > { %p793_p3 = pneg %p792_p0 }
  0x1a   : > { %p800_p4 = pnand %p799_p6, %p793_p3 }
  0x1c   : > { %803 = shalt.err (!%p800_p4)
}
  0x1d   : > { %s919_s30 = smov 128   ;;  %s920_s4 = smov 8  }
  0x1e   : > { %710 = dma.hbm_to_vmem [thread:$0]  (!%p1010_p11), %s1127_s1, 512, %s148_s26, [#allocation6], %s919_s30, %s919_s30, %s920_s4  }
  0x1f   : > { %p34_p6 = scmp.ge.s32.totalorder %s32_s28, 2  ;;  %s41_s7 = sadd.s32 1, %s904_s14 }
  0x20   : > { %p48_p4 = scmp.ne.s32.totalorder %s904_s14, %s900_s13  ;;  %p49_p9 = scmp.eq.s32.totalorder %s916_s17, 0 }
  0x21   : > { %s1149_s28 = smov (%p34_p6, %s32_s28), 0  ;;  %p720_p0 = scmp.lt.s32.totalorder %s916_s17, 2 }
  0x22   : > { %p1028_p12 = por %p49_p9, %p48_p4  ;;  %p1034_p13 = por %p985_p2, %p48_p4 }
  0x23   : > { %s36_s10 = ssub.s32 %s912_s16, %s1149_s28  ;;  %s164_s11 = sand.u32 1, %s904_s14  }
  0x24   : > { %p39_p11 = scmp.eq.s32.totalorder %s36_s10, 0  ;;  %s651_s18 = sshll.u32 %s164_s11, 4 }
  0x25   : > { %s670_s25 = sshll.u32 %s912_s16, 8  ;;  %s168_s30 = scalar_lea.vmem [#allocation2], %s651_s18 }
  0x26   : > { %s1043_s19 = scalar_select %p39_p11, %s904_s14, %s41_s7  }
  0x27   : > { %s175_s29 = scalar_lea.hbm %s1126_s0, %s670_s25  ;;  %s176_s4 = sshll.u32 %s168_s30, 4  ;;  %s177_s4 = int_to_ptr.vmem [resolvable:$true] %s176_s4 }
  0x28   : > { %p1051_p2 = pnand %p720_p0, %p1028_p12  ;;  %s165_s5 = scalar_lea.sflag [#allocation3], %s164_s11 }
  0x29   : > { %s817_s6 = scalar_lea.vmem %s177_s4, 256  ;;  %s921_s7 = smov [#allocation2]  }
  0x2a   : > { %p806_p3 = pneg %p1051_p2  ;;  %p818_p5 = scmp.ne.s32.totalorder %s177_s4, %s817_s6 }
  0x2b   : > { %s822_s10 = sshll.u32 %s921_s7, 4  ;;  %s823_s10 = int_to_ptr.vmem [resolvable:$false] %s822_s10 }
  0x2c   : > { %p820_p7 = pnand %p818_p5, %p806_p3  ;;  %s824_s25 = scalar_lea.vmem %s823_s10, 512 }
  0x2d   : > { %p825_p4 = scmp.lt.s32.totalorder %s177_s4, %s823_s10  ;;  %p826_p9 = scmp.lt.s32.totalorder %s824_s25, %s817_s6 }
  0x2e   : > { %p821_p6 = pneg %p820_p7 }
  0x2f   : > { %p827_p11 = por %p826_p9, %p825_p4 }
  0x31   : > { %p828_p10 = pnand %p827_p11, %p821_p6 }
  0x33   : > { %831 = shalt.err (!%p828_p10)
}
  0x34   : > { %s922_s8 = smov 64   ;;  %s923_s18 = smov 4  }
  0x35   : > { %714 = dma.hbm_to_vmem [thread:$0]  (!%p1051_p2), %s175_s29, 256, %s177_s4, %s165_s5, %s922_s8, %s922_s8, %s923_s18  }
  0x36   : > { %188 = sbr.rel (%p1001_p8) target bundleno = 282 (0x11a), region = 32  ;;  %s1062_s11 = sand.u32 (!%p1001_p8), 1, %s900_s13  }
  0x37   : > { %s655_s26 = sshll.u32 (!%p1001_p8), %s1062_s11, 4  ;;  %s191_s27 = scalar_lea.sflag (!%p1001_p8), [#allocation3], %s1062_s11 }
  0x38   : > { %s194_s30 = scalar_lea.vmem (!%p1001_p8), [#allocation2], %s655_s26  ;;  %p1140_p12 = scmp.ne.s32.totalorder (!%p1001_p8), %s1133_s22, 0 }
  0x3b   : > { %883 = dma.done.wait (%p1140_p12), %s191_s27, 256  }
  0x3c   : > { %885 = vsyncadd (%p1140_p12), %s191_s27, 4294967040 }
  0x3d   : > { %887 = dma.done.wait (%p981_p1), [#allocation6], 512  }
  0x3e   : > { %889 = vsyncadd (%p981_p1), [#allocation6], 4294966784  ;;  %v924_v0 = vmov 0.0   ;;  %vm925_vm0 = vmmov 0   ;;  %vm227_vm1 = vcmask 64512   ;;  %v226_v1 = vld [vmem:[#allocation5 + $0x8] sm:$0xff] }
  0x3f   : > { %679 = vmatprep.subr.mxu0 %v924_v0  ;;  %681 = vmatprep.mubr.msk.f32.mxu0 %vm925_vm0, %v924_v0  ;;  %v658_v2 = vld [vmem:[%s194_s30 + $0x4] sm:$0xf]  ;;  %v221_v4 = vld [vmem:[%s194_s30] sm:$0xf]  ;;  %v455_v6 = vld [vmem:[#allocation5 + $0x18] sm:$0xff]  ;;  %s657_s20 = sshll.u32 %s1062_s11, 2 }
  0x40   : > { %684 = vmatprep.subr.mxu1 %v924_v0  ;;  %686 = vmatprep.mubr.msk.f32.mxu1 %vm925_vm0, %v924_v0  ;;  %v222_v3 = vld [vmem:[#allocation5] sm:$0xff]  ;;  %v377_v5 = vld [vmem:[#allocation5 + $0x10] sm:$0xff]  ;;  %v661_v7 = vld [vmem:[%s194_s30 + $0x8] sm:$0xf]  ;;  %s667_s29 = sshll.u32 %s908_s15, 6  ;;  %s220_s4 = scalar_lea.vmem [#allocation7], %s657_s20 }
  0x41   : > { %680 = vmatpush3.msra.mxu0 %v226_v1  ;;  %685 = vmatpush3.msra.mxu1 %v222_v3  ;;  %v663_v8 = vld [vmem:[%s194_s30 + $0xc] sm:$0xf]  ;;  %v665_v17 = vld [vmem:[%s1128_s2] ss:$0 sm:$0xff]  ;;  %s555_s21 = sshll.u32 %s220_s4, 4  ;;  %vm538_vm2 = vcmask 257024   ;;  %s553_s7 = scalar_lea.hbm %s1129_s3, %s667_s29  ;;  %s556_s21 = int_to_ptr.vmem [resolvable:$true] %s555_s21 }
  0x42   : > { %682 = vmatmul.mubr.msk.f32.vlgmr.msra.gmra.mxu0 %vm227_vm1, %v658_v2  ;;  %689 = vmatprep.subr.mxu0 %v924_v0  ;;  %s541_s10 = scalar_lea.sflag [#allocation4], %s1062_s11  ;;  %s832_s25 = scalar_lea.vmem %s556_s21, 64 }
  0x43   : > { %687 = vmatmul.mubr.msk.f32.vlgmr.msra.gmra.mxu1 %vm227_vm1, %v221_v4  ;;  %690 = vmatpush3.msra.mxu0 %v377_v5  ;;  %p833_p1 = scmp.ne.s32.totalorder %s556_s21, %s832_s25  ;;  %s926_s8 = smov [#allocation7]  }
  0x44   : > { %694 = vmatprep.subr.mxu1 %v924_v0  ;;  %691 = vmatprep.mubr.msk.f32.mxu0 %vm925_vm0, %v924_v0  ;;  %s836_s15 = sshll.u32 %s926_s8, 4  ;;  %s837_s15 = int_to_ptr.vmem [resolvable:$false] %s836_s15 }
  0x45   : > { %695 = vmatpush3.msra.mxu1 %v455_v6  ;;  %696 = vmatprep.mubr.msk.f32.mxu1 %vm925_vm0, %v924_v0  ;;  %p834_p8 = pnand %p833_p1, %p1034_p13  ;;  %s838_s18 = scalar_lea.vmem %s837_s15, 128 }
  0x46   : > { %692 = vmatmul.mubr.msk.f32.vlgmr.msra.gmra.mxu0 %vm227_vm1, %v661_v7  ;;  %p839_p0 = scmp.lt.s32.totalorder %s556_s21, %s837_s15  ;;  %p840_p2 = scmp.lt.s32.totalorder %s838_s18, %s832_s25 }
  0x47   : > { %697 = vmatmul.mubr.msk.f32.vlgmr.msra.gmra.mxu1 %vm227_vm1, %v663_v8  ;;  %p835_p10 = pneg %p834_p8 }
  0x48   : > { %p841_p3 = por %p840_p2, %p839_p0 }
  0x4a   : > { %p842_p5 = pnand %p841_p3, %p835_p10 }
 0x102   : > { %v297_v9 = vpop.f32.mrf.mxu0 }
 0x103   : > { %v370_v10 = vpop.f32.mrf.mxu1 }
 0x104   : > { %v683_v11 = vpop.f32.mrf.mxu0  ;;  %v371_v12 = vadd.f32 %v370_v10, %v297_v9 }
 0x105   : > { %v688_v13 = vpop.f32.mrf.mxu1 }
 0x106   : > { %v447_v14 = vpop.f32.mrf.mxu0 }
 0x107   : > { %v451_v15 = vadd.f32 %v447_v14, %v371_v12  ;;  %v525_v16 = vpop.f32.mrf.mxu1 }
 0x108   : > { %v693_v18 = vpop.f32.mrf.mxu0 }
 0x109   : > { %v529_v19 = vadd.f32 %v525_v16, %v451_v15  ;;  %v698_v20 = vpop.f32.mrf.mxu1 }
 0x10b   : > { %v537_v21 = vadd.f32 %v665_v17, %v529_v19 }
 0x10d   : > { %539 = vst.msk [vmem:[%s220_s4] sm:$0xf] %vm538_vm2, %v537_v21 }
 0x10e   : > { %845 = shalt.err (!%p842_p5)
}
 0x10f   : > { %s846_s26 = scalar_lea.hbm %s553_s7, 64  ;;  %s850_s30 = scalar_lea.hbm %s1129_s3, 128 }
 0x110   : > { %p847_p7 = scmp.ne.s32.totalorder %s553_s7, %s846_s26  ;;  %p851_p9 = scmp.lt.s32.totalorder %s553_s7, %s1129_s3 }
 0x111   : > { %p852_p11 = scmp.lt.s32.totalorder %s850_s30, %s846_s26 }
 0x112   : > { %p848_p6 = pnand %p847_p7, %p1034_p13 }
 0x113   : > { %p853_p12 = por %p852_p11, %p851_p9 }
 0x114   : > { %p849_p4 = pneg %p848_p6 }
 0x116   : > { %p854_p1 = pnand %p853_p12, %p849_p4 }
 0x118   : > { %857 = shalt.err (!%p854_p1)
}
 0x119   : > { %705 = dma.vmem_to_hbm [thread:$0]  (%p1034_p13), %s556_s21, 64, %s553_s7, %s541_s10  }
 0x11a PF: > { %s567_s24 = sand.u32 1, %s896_s12   ;;  %p1141_p8 = scmp.ne.s32.totalorder %s1134_s23, 0 }
 0x11b   : > { %p1142_p10 = scmp.ge.s32.totalorder %s916_s17, 2  ;;  %s568_s29 = scalar_lea.sflag [#allocation4], %s567_s24 }
 0x11d   : > { %p716_p0 = pnand %p1142_p10, %p1141_p8 }
 0x11f   : > { %p717_p2 = pneg %p716_p0 }
 0x121   : > { %891 = dma.done.wait (%p717_p2), %s568_s29, 64  }
 0x122   : > { %893 = vsyncadd (%p717_p2), %s568_s29, 4294967232  ;;  %s20_s17 = sadd.s32 1, %s916_s17   ;;  %s1143_s12 = smov %s900_s13 }
 0x123   : > { %p17_p3 = scmp.ge.s32.totalorder %s20_s17, 4   ;;  %s1144_s13 = smov %s904_s14 }
 0x124   : > { %s1145_s14 = smov %s1043_s19  ;;  %s1146_s15 = smov %s912_s16 }
 0x125   : > { %s1147_s16 = smov %s1149_s28  ;;  %19 = sbr.rel (!%p17_p3) target bundleno = 7 (0x7), region = 87 }
 0x12a   :  { %573 = vsyncpa [#allocation3], 1 }
 0x12b   :  { %575 = vsyncpa [#allocation3 + $0x1], 1 }
 0x12c   :  { %576 = vsyncpa [#allocation6], 1 }
 0x12d   :  { %577 = vsyncpa [#allocation4], 1 }
 0x12e   :  { %579 = vsyncpa [#allocation4 + $0x1], 1 }

</bundles_post_ra>
